<compile_context>
chip_gen: v7x
topology: tpu7x:2x2x1
jax: 0.10.0
libtpu: 0.0.40
codegen_flags: <defaults>
</compile_context>

<pallas_src>
import jax
import jax.numpy as jnp
from jax.experimental import pallas as pl
from jax.experimental.pallas import tpu as pltpu


def _quadratic_kernel(x_ref, wl_ref, wq_ref, seg_ref, b_ref, o_ref):
    x = x_ref[...]                                   # (block_bf, W) f32, dense lanes
    wl = wl_ref[...]                                 # (1, W) f32, sublane-broadcast
    wq = wq_ref[...]                                 # (1, W) f32

    # Fused VPU pointwise: per-element contribution of both branches.
    t = x * (wl + x * wq)                            # == x*wl + (x*x)*wq

    # Exact-f32 segmented reduce on the otherwise-idle MXU:
    # split t into three bf16 terms (t == hi + mid + lo to ~2^-27 rel error);
    # products against the 0/1 segment matrix are exact, accumulation is f32.
    hi = t.astype(jnp.bfloat16)
    r1 = t - hi.astype(jnp.float32)
    mid = r1.astype(jnp.bfloat16)
    lo = (r1 - mid.astype(jnp.float32)).astype(jnp.bfloat16)

    seg = seg_ref[...]                               # (W, fold) bf16, 0/1 entries
    acc = jnp.dot(hi, seg, preferred_element_type=jnp.float32)
    acc = acc + jnp.dot(mid, seg, preferred_element_type=jnp.float32)
    acc = acc + jnp.dot(lo, seg, preferred_element_type=jnp.float32)

    # Scalar bias from SMEM; compact (block_bf, fold) store.
    o_ref[...] = (acc + b_ref[0, 0]).astype(o_ref.dtype)


def _round_up(a, m):
    return (a + m - 1) // m * m


def quadratic_forward(x, w_lin, w_quad, bias, *, block_rows=8192):
    """x: (B, n_input) f32.  w_lin / w_quad: (1, n_input) (nn.Linear weight
    layout; quadratic branch has no bias).  bias: scalar / (1,) / (1, 1).
    Returns (B, 1)."""
    B, n_input = x.shape
    dtype = x.dtype

    # Lane-folding factor: pack `fold` consecutive samples into one 128-lane row.
    if n_input < 128 and 128 % n_input == 0:
        fold = 128 // n_input
    else:
        fold = 1  # TODO(synk): n_input not dividing 128 falls back to lane-padded rows.
    W = fold * n_input
    lane_w = _round_up(W, 128)                       # padded lane width in VMEM

    w_lin = jnp.asarray(w_lin, dtype).reshape(1, n_input)
    w_quad = jnp.asarray(w_quad, dtype).reshape(1, n_input)
    bias = jnp.asarray(bias, dtype).reshape(1, 1)
    wl_t = jnp.tile(w_lin, (1, fold))                # (1, W)
    wq_t = jnp.tile(w_quad, (1, fold))               # (1, W)

    # 0/1 segment-sum matrix: lane l belongs to segment l // n_input (exact in bf16).
    seg = (jnp.arange(W)[:, None] // n_input) == jnp.arange(fold)[None, :]
    seg = seg.astype(jnp.bfloat16)                   # (W, fold)

    # Pad the batch only so it folds evenly (<= fold-1 zero rows).
    B_pad = _round_up(B, fold)
    if B_pad != B:
        x = jnp.pad(x, ((0, B_pad - B), (0, 0)))
    B_f = B_pad // fold
    x_f = x.reshape(B_f, W)                          # free row-major reshape

    # ---- block size selection ----
    # Big blocks amortize the ~0.35 us per-grid-step overhead; a ~4 MiB/buffer
    # VMEM budget (double-buffered -> ~8 MiB of X) keeps us safe on every
    # generation (16/32 MiB scoped defaults; v7x has only 64 MiB physical) and
    # guards against large n_input.  For very large batches, cap the block so
    # the "parallel" grid keeps >= 8 steps (both v7x TensorCores busy, DMA hidden).
    vmem_per_buffer = 4 * 1024 * 1024
    block_bf = max(8, block_rows // fold)
    block_bf = min(block_bf, max(8, vmem_per_buffer // (lane_w * 4)))
    min_steps = 8
    if B_f >= min_steps * 2048:
        block_bf = min(block_bf, _round_up(pl.cdiv(B_f, min_steps), 8))
    if B_f <= 8:
        block_bf = B_f                               # tiny batch: one full block
    else:
        block_bf = max(8, (min(block_bf, B_f) // 8) * 8)

    grid = (pl.cdiv(B_f, block_bf),)                 # partial last block is fine

    out = pl.pallas_call(
        _quadratic_kernel,
        out_shape=jax.ShapeDtypeStruct((B_f, fold), dtype),
        grid_spec=pltpu.PrefetchScalarGridSpec(
            num_scalar_prefetch=0,
            grid=grid,
            in_specs=[
                pl.BlockSpec((block_bf, W), lambda i: (i, 0)),      # X tile (dense lanes)
                pl.BlockSpec((1, W), lambda i: (0, 0)),             # tiled W_lin (resident)
                pl.BlockSpec((1, W), lambda i: (0, 0)),             # tiled W_quad (resident)
                pl.BlockSpec((W, fold), lambda i: (0, 0)),          # segment-sum matrix
                pl.BlockSpec(memory_space=pltpu.MemorySpace.SMEM),  # bias scalar
            ],
            out_specs=pl.BlockSpec((block_bf, fold), lambda i: (i, 0)),
        ),
        compiler_params=pltpu.CompilerParams(
            # Batch axis is embarrassingly parallel -> megacore-shardable (v7x).
            dimension_semantics=("parallel",),
            # Explicit scoped-VMEM limit: >= our ~10 MiB need, <= safe on all gens.
            vmem_limit_bytes=32 * 1024 * 1024,
        ),
    )(x_f, wl_t, wq_t, seg, bias)

    # (B_f, fold) row-major == original sample order -> (B, 1).
    return out.reshape(B_pad, 1)[:B]


def reference_forward(x, w_lin, w_quad, bias):
    # Exact f32 reference (pure elementwise + reduce; avoids any MXU/precision
    # ambiguity of jnp matmuls on TPU).
    wl = jnp.reshape(w_lin, (1, -1))
    wq = jnp.reshape(w_quad, (1, -1))
    b = jnp.reshape(bias, (1, 1))
    return (jnp.sum(x * wl, axis=-1, keepdims=True)
            + jnp.sum((x * x) * wq, axis=-1, keepdims=True) + b)


if __name__ == "__main__":
    n_input = 32
    batch = 256

    key = jax.random.PRNGKey(0)
    kx, kwl, kwq, kb = jax.random.split(key, 4)

    # Deterministic synthetic parameters (PyTorch uses uniform(-1/sqrt(n), 1/sqrt(n))).
    bound = 1.0 / (n_input ** 0.5)
    w_lin = jax.random.uniform(kwl, (1, n_input), jnp.float32, -bound, bound)
    w_quad = jax.random.uniform(kwq, (1, n_input), jnp.float32, -bound, bound)
    bias = jax.random.uniform(kb, (1,), jnp.float32, -bound, bound)

    x = jax.random.normal(kx, (batch, n_input), jnp.float32)

    out = quadratic_forward(x, w_lin, w_quad, bias)
    out = jax.block_until_ready(out)

    ref = reference_forward(x, w_lin, w_quad, bias)
    assert out.shape == (batch, 1)
    assert jnp.allclose(out, ref, atol=1e-5, rtol=1e-5), "mismatch vs. reference"

    print("KERNEL_OK")
</pallas_src>

<mosaic_0001>
module attributes {stable_mosaic.version = 11 : i64} {
  func.func @_quadratic_kernel(%arg0: i32, %arg1: memref<64x128xf32, #tpu.memory_space<vmem>>, %arg2: memref<1x128xf32, #tpu.memory_space<vmem>>, %arg3: memref<1x128xf32, #tpu.memory_space<vmem>>, %arg4: memref<128x4xbf16, #tpu.memory_space<vmem>>, %arg5: memref<1x1xf32, #tpu.memory_space<smem>>, %arg6: memref<64x4xf32, #tpu.memory_space<vmem>>) attributes {dimension_semantics = [#tpu.dimension_semantics<parallel>], iteration_bounds = array<i64: 1>, scalar_prefetch = 0 : i64, scratch_operands = 0 : i64, tpu.core_type = #tpu.core_type<tc>, window_params = [{transform_indices = @transform_0, window_bounds = array<i64: 64, 128>}, {pipeline_mode = #tpu.pipeline_mode<synchronous>, transform_indices = @transform_1, window_bounds = array<i64: 1, 128>}, {pipeline_mode = #tpu.pipeline_mode<synchronous>, transform_indices = @transform_2, window_bounds = array<i64: 1, 128>}, {pipeline_mode = #tpu.pipeline_mode<synchronous>, transform_indices = @transform_3, window_bounds = array<i64: 128, 4>}, {transform_indices = @transform_4, window_bounds = array<i64: 1, 1>}, {transform_indices = @transform_5, window_bounds = array<i64: 64, 4>}]} {
    %c0 = arith.constant 0 : index
    %c0_0 = arith.constant 0 : index
    %0 = vector.load %arg1[%c0, %c0_0] : memref<64x128xf32, #tpu.memory_space<vmem>>, vector<64x128xf32>
    %c0_1 = arith.constant 0 : index
    %c0_2 = arith.constant 0 : index
    %1 = vector.load %arg2[%c0_1, %c0_2] : memref<1x128xf32, #tpu.memory_space<vmem>>, vector<1x128xf32>
    %c0_3 = arith.constant 0 : index
    %c0_4 = arith.constant 0 : index
    %2 = vector.load %arg3[%c0_3, %c0_4] : memref<1x128xf32, #tpu.memory_space<vmem>>, vector<1x128xf32>
    %3 = vector.broadcast %2 : vector<1x128xf32> to vector<64x128xf32>
    %4 = arith.mulf %0, %3 : vector<64x128xf32>
    %5 = vector.broadcast %1 : vector<1x128xf32> to vector<64x128xf32>
    %6 = arith.addf %5, %4 : vector<64x128xf32>
    %7 = arith.mulf %0, %6 : vector<64x128xf32>
    %8 = arith.truncf %7 : vector<64x128xf32> to vector<64x128xbf16>
    %9 = arith.extf %8 : vector<64x128xbf16> to vector<64x128xf32>
    %10 = arith.subf %7, %9 : vector<64x128xf32>
    %11 = arith.truncf %10 : vector<64x128xf32> to vector<64x128xbf16>
    %12 = arith.extf %11 : vector<64x128xbf16> to vector<64x128xf32>
    %13 = arith.subf %10, %12 : vector<64x128xf32>
    %14 = arith.truncf %13 : vector<64x128xf32> to vector<64x128xbf16>
    %c0_5 = arith.constant 0 : index
    %c0_6 = arith.constant 0 : index
    %15 = vector.load %arg4[%c0_5, %c0_6] : memref<128x4xbf16, #tpu.memory_space<vmem>>, vector<128x4xbf16>
    %cst = arith.constant dense<0.000000e+00> : vector<64x4xf32>
    %16 = tpu.matmul %8, %15, %cst {dimension_numbers = #tpu.dot_dimension_numbers<[1], [0], [0], [1], [0, 0, 1, 1], [], []>} : vector<64x128xbf16>, vector<128x4xbf16>, vector<64x4xf32> -> vector<64x4xf32>
    %cst_7 = arith.constant dense<0.000000e+00> : vector<64x4xf32>
    %17 = tpu.matmul %11, %15, %cst_7 {dimension_numbers = #tpu.dot_dimension_numbers<[1], [0], [0], [1], [0, 0, 1, 1], [], []>} : vector<64x128xbf16>, vector<128x4xbf16>, vector<64x4xf32> -> vector<64x4xf32>
    %18 = arith.addf %16, %17 : vector<64x4xf32>
    %cst_8 = arith.constant dense<0.000000e+00> : vector<64x4xf32>
    %19 = tpu.matmul %14, %15, %cst_8 {dimension_numbers = #tpu.dot_dimension_numbers<[1], [0], [0], [1], [0, 0, 1, 1], [], []>} : vector<64x128xbf16>, vector<128x4xbf16>, vector<64x4xf32> -> vector<64x4xf32>
    %20 = arith.addf %18, %19 : vector<64x4xf32>
    %c0_9 = arith.constant 0 : index
    %c0_10 = arith.constant 0 : index
    %21 = memref.load %arg5[%c0_9, %c0_10] : memref<1x1xf32, #tpu.memory_space<smem>>
    %22 = vector.broadcast %21 : f32 to vector<64x4xf32>
    %23 = arith.addf %20, %22 : vector<64x4xf32>
    %c0_11 = arith.constant 0 : index
    %c0_12 = arith.constant 0 : index
    %24 = vector.load %arg6[%c0_11, %c0_12] : memref<64x4xf32, #tpu.memory_space<vmem>>, vector<64x4xf32>
    tpu.vector_store %arg6[%c0_11, %c0_12], %23 {strides = array<i32>} : memref<64x4xf32, #tpu.memory_space<vmem>>, vector<64x4xf32>,
    return
  }
  func.func @transform_0(%arg0: i32) -> (i32, i32) {
    %c0_i32 = arith.constant 0 : i32
    %c0_i32_0 = arith.constant 0 : i32
    return %arg0, %c0_i32 : i32, i32
  }
  func.func @transform_1(%arg0: i32) -> (i32, i32) {
    %c0_i32 = arith.constant 0 : i32
    %c0_i32_0 = arith.constant 0 : i32
    %c0_i32_1 = arith.constant 0 : i32
    return %c0_i32, %c0_i32_0 : i32, i32
  }
  func.func @transform_2(%arg0: i32) -> (i32, i32) {
    %c0_i32 = arith.constant 0 : i32
    %c0_i32_0 = arith.constant 0 : i32
    %c0_i32_1 = arith.constant 0 : i32
    return %c0_i32, %c0_i32_0 : i32, i32
  }
  func.func @transform_3(%arg0: i32) -> (i32, i32) {
    %c0_i32 = arith.constant 0 : i32
    %c0_i32_0 = arith.constant 0 : i32
    %c0_i32_1 = arith.constant 0 : i32
    return %c0_i32, %c0_i32_0 : i32, i32
  }
  func.func @transform_4(%arg0: i32) -> (i32, i32) {
    %c0_i32 = arith.constant 0 : i32
    %c0_i32_0 = arith.constant 0 : i32
    %c0_i32_1 = arith.constant 0 : i32
    return %c0_i32, %c0_i32_0 : i32, i32
  }
  func.func @transform_5(%arg0: i32) -> (i32, i32) {
    %c0_i32 = arith.constant 0 : i32
    %c0_i32_0 = arith.constant 0 : i32
    return %arg0, %c0_i32 : i32, i32
  }
}

</mosaic_0001>

<bundles_post_ra>
// kernel: tpu_custom_call.1
= control target key start
LH: loop header
LB: loop body
LE: loop exit
PB: predicated region body
PF: predicated region fallthrough
CT: control target
= control target key end

     0   :  { %vm389_vm0 = vcmask 31744   ;;  %s767_s3 = inlined_call_operand.vmem [shape: bf16[128,4], index: 3, kind: input, shape index: {}]   ;;  %s768_s0 = inlined_call_operand.vmem [shape: f32[64,128], index: 0, kind: input, shape index: {}]   ;;  %s769_s1 = inlined_call_operand.vmem [shape: f32[1,128], index: 1, kind: input, shape index: {}]   ;;  %s770_s2 = inlined_call_operand.vmem [shape: f32[1,128], index: 2, kind: input, shape index: {}]   ;;  %s771_s4 = inlined_call_operand.<no memory space> [shape: f32[1,1], index: 4, kind: input, shape index: {}]   ;;  %s772_s5 = inlined_call_operand.vmem [shape: f32[64,4], index: 5, kind: output, shape index: {}]  }
   0x1   :  { %v593_v0 = vld [vmem:[%s767_s3] sm:$0xff]   ;;  %v598_v1 = vld [vmem:[%s767_s3 + $0x8] sm:$0xff]   ;;  %v609_v2 = vld [vmem:[%s767_s3 + $0x10] sm:$0xff]  }
   0x2   :  { %448 = vmatprep.subr.bf16.mxu1 %v593_v0  ;;  %472 = vmatprep.subr.bf16.mxu0 %v593_v0  ;;  %v616_v3 = vld [vmem:[%s767_s3 + $0x18] sm:$0xff]   ;;  %v22_v4 = vld [vmem:[%s768_s0] sm:$0xff]  ;;  %v23_v5 = vld [vmem:[%s768_s0 + $0x8] sm:$0xff] }
   0x3   :  { %449 = vmatpush3.bf16.msra.mxu1 %v593_v0  ;;  %473 = vmatpush3.bf16.msra.mxu0 %v593_v0  ;;  %v403_v6 = vld [vmem:[%s769_s1] ss:$0 sm:$0xff]  ;;  %v24_v8 = vld [vmem:[%s768_s0 + $0x10] sm:$0xff]  ;;  %v25_v9 = vld [vmem:[%s768_s0 + $0x18] sm:$0xff] }
   0x4   :  { %450 = vmatprep.subr.bf16.mxu1 %v598_v1  ;;  %474 = vmatprep.subr.bf16.mxu0 %v598_v1  ;;  %v402_v7 = vld [vmem:[%s770_s2] ss:$0 sm:$0xff]  ;;  %v27_v15 = vld [vmem:[%s768_s0 + $0x28] sm:$0xff]  ;;  %v28_v16 = vld [vmem:[%s768_s0 + $0x30] sm:$0xff] }
   0x5   :  { %v38_v10 = vmul.f32 %v402_v7, %v22_v4  ;;  %v39_v11 = vmul.f32 %v402_v7, %v23_v5  ;;  %v40_v12 = vmul.f32 %v402_v7, %v24_v8  ;;  %v41_v13 = vmul.f32 %v402_v7, %v25_v9  ;;  %v26_v14 = vld [vmem:[%s768_s0 + $0x20] sm:$0xff]  ;;  %v29_v19 = vld [vmem:[%s768_s0 + $0x38] sm:$0xff]  ;;  %v666_v35 = vld [vmem:[%s767_s3 + $0x28] sm:$0xff]  }
   0x6   :  { %v42_v17 = vmul.f32 %v402_v7, %v26_v14  ;;  %v43_v18 = vmul.f32 %v402_v7, %v27_v15  ;;  %v657_v20 = vld [vmem:[%s767_s3 + $0x20] sm:$0xff]   ;;  %v44_v27 = vmul.f32 %v402_v7, %v28_v16  ;;  %v45_v31 = vmul.f32 %v402_v7, %v29_v19  ;;  %v675_v43 = vld [vmem:[%s767_s3 + $0x30] sm:$0xff]   ;;  %v684_v53 = vld [vmem:[%s767_s3 + $0x38] sm:$0xff]  }
   0x7   :  { %451 = vmatpush3.bf16.msra.mxu1 %v598_v1  ;;  %475 = vmatpush3.bf16.msra.mxu0 %v598_v1  ;;  %v52_v21 = vadd.f32 %v403_v6, %v38_v10  ;;  %v53_v22 = vadd.f32 %v403_v6, %v39_v11  ;;  %v54_v23 = vadd.f32 %v403_v6, %v40_v12 }
   0x8   :  { %452 = vmatprep.subr.bf16.mxu1 %v609_v2  ;;  %476 = vmatprep.subr.bf16.mxu0 %v609_v2  ;;  %v55_v24 = vadd.f32 %v403_v6, %v41_v13  ;;  %v56_v25 = vadd.f32 %v403_v6, %v42_v17  ;;  %v57_v26 = vadd.f32 %v403_v6, %v43_v18 }
   0x9   :  { %v60_v28 = vmul.f32 %v52_v21, %v22_v4  ;;  %v61_v29 = vmul.f32 %v53_v22, %v23_v5  ;;  %v62_v30 = vmul.f32 %v54_v23, %v24_v8  ;;  %v58_v37 = vadd.f32 %v403_v6, %v44_v27 }
   0xa   :  { %v63_v32 = vmul.f32 %v55_v24, %v25_v9  ;;  %v64_v33 = vmul.f32 %v56_v25, %v26_v14  ;;  %v65_v34 = vmul.f32 %v57_v26, %v27_v15  ;;  %v59_v41 = vadd.f32 %v403_v6, %v45_v31 }
   0xb   :  { %453 = vmatpush3.bf16.msra.mxu1 %v609_v2  ;;  %477 = vmatpush3.bf16.msra.mxu0 %v609_v2  ;;  %v68_v36 = vpack.c.bf16 %v61_v29, %v60_v28  ;;  %v66_v46 = vmul.f32 %v58_v37, %v28_v16 }
   0xc   :  { %454 = vmatprep.subr.bf16.mxu1 %v616_v3  ;;  %478 = vmatprep.subr.bf16.mxu0 %v616_v3  ;;  %v69_v40 = vpack.c.bf16 %v63_v32, %v62_v30  ;;  %v70_v42 = vpack.c.bf16 %v65_v34, %v64_v33  ;;  %v67_v50 = vmul.f32 %v59_v41, %v29_v19 }
   0xd   :  { %v72_v38 = vunpack.c.l.bf16 %v68_v36  ;;  %v73_v39 = vunpack.c.h.bf16 %v68_v36  ;;  %488 = vmatprep.mubr.bf16.mxu0 %v68_v36 }
   0xe   :  { %v74_v48 = vunpack.c.l.bf16 %v69_v40  ;;  %v75_v49 = vunpack.c.h.bf16 %v69_v40  ;;  %v76_v51 = vunpack.c.l.bf16 %v70_v42  ;;  %v77_v52 = vunpack.c.h.bf16 %v70_v42 }
   0xf   :  { %455 = vmatpush3.bf16.msra.mxu1 %v616_v3  ;;  %479 = vmatpush3.bf16.msra.mxu0 %v616_v3  ;;  %v80_v44 = vsub.f32 %v60_v28, %v72_v38  ;;  %v81_v45 = vsub.f32 %v61_v29, %v73_v39  ;;  %v71_v56 = vpack.c.bf16 %v67_v50, %v66_v46  ;;  %v380_v39 = vstv %s771_s4 }
  0x10   :  { %456 = vmatprep.subr.bf16.mxu1 %v657_v20  ;;  %480 = vmatprep.subr.bf16.mxu0 %v657_v20  ;;  %v686_v54 = vsub.f32 %v62_v30, %v74_v48  ;;  %v688_v55 = vsub.f32 %v63_v32, %v75_v49  ;;  %v84_v57 = vsub.f32 %v64_v33, %v76_v51 }
  0x11   :  { %v88_v47 = vpack.c.bf16 %v81_v45, %v80_v44  ;;  %v85_v58 = vsub.f32 %v65_v34, %v77_v52  ;;  %v78_v60 = vunpack.c.l.bf16 %v71_v56  ;;  %v79_v61 = vunpack.c.h.bf16 %v71_v56 }
  0x12   :  { %v89_v59 = vpack.c.bf16 %v688_v55, %v686_v54 }
  0x13   :  { %457 = vmatpush3.bf16.msra.mxu1 %v657_v20  ;;  %481 = vmatpush3.bf16.msra.mxu0 %v657_v20  ;;  %v90_v62 = vpack.c.bf16 %v85_v58, %v84_v57  ;;  %v92_v63 = vunpack.c.l.bf16 %v88_v47  ;;  %v93_v4 = vunpack.c.h.bf16 %v88_v47  ;;  %v86_v7 = vsub.f32 %v66_v46, %v78_v60 }
  0x14   :  { %458 = vmatprep.subr.bf16.mxu1 %v666_v35  ;;  %482 = vmatprep.subr.bf16.mxu0 %v666_v35  ;;  %v87_v8 = vsub.f32 %v67_v50, %v79_v61 }
  0x15   :  { %464 = vmatprep.mubr.bf16.mxu1 %v88_v47  ;;  %v96_v5 = vunpack.c.l.bf16 %v90_v62  ;;  %v97_v6 = vunpack.c.h.bf16 %v90_v62  ;;  %v100_v9 = vsub.f32 %v80_v44, %v92_v63  ;;  %v101_v10 = vsub.f32 %v81_v45, %v93_v4 }
  0x16   :  { %v91_v13 = vpack.c.bf16 %v87_v8, %v86_v7 }
  0x17   :  { %459 = vmatpush3.bf16.msra.mxu1 %v666_v35  ;;  %483 = vmatpush3.bf16.msra.mxu0 %v666_v35  ;;  %v104_v11 = vsub.f32 %v84_v57, %v96_v5  ;;  %v105_v12 = vsub.f32 %v85_v58, %v97_v6 }
  0x18   :  { %460 = vmatprep.subr.bf16.mxu1 %v675_v43  ;;  %484 = vmatprep.subr.bf16.mxu0 %v675_v43  ;;  %v98_v15 = vunpack.c.l.bf16 %v91_v13  ;;  %v99_v16 = vunpack.c.h.bf16 %v91_v13 }
  0x19   :  { %v110_v14 = vpack.c.bf16 %v105_v12, %v104_v11 }
  0x1a   :  { %v106_v18 = vsub.f32 %v86_v7, %v98_v15  ;;  %v107_v19 = vsub.f32 %v87_v8, %v99_v16 }
  0x1b   :  { %461 = vmatpush3.bf16.msra.mxu1 %v675_v43  ;;  %485 = vmatpush3.bf16.msra.mxu0 %v675_v43 }
  0x1c   :  { %462 = vmatprep.subr.bf16.mxu1 %v684_v53  ;;  %486 = vmatprep.subr.bf16.mxu0 %v684_v53  ;;  %v111_v21 = vpack.c.bf16 %v107_v19, %v106_v18 }
  0x1f   :  { %463 = vmatpush3.bf16.msra.mxu1 %v684_v53  ;;  %487 = vmatpush3.bf16.msra.mxu0 %v684_v53 }
  0x20   :  { %496 = vmatprep.subr.bf16.mxu0 %v593_v0  ;;  %520 = vmatprep.subr.bf16.mxu1 %v593_v0 }
  0x22   :  { %465 = vmatmul.mubr.bf16.vlgmr.msra.gmra.mrb[0].mxu1 %v89_v59  ;;  %489 = vmatmul.mubr.bf16.vlgmr.msra.gmra.mrb[0].mxu0 %v69_v40 }
  0x23   :  { %497 = vmatpush3.bf16.msra.mxu0 %v593_v0  ;;  %528 = vmatpush3.bf16.msra.mxu1 %v593_v0  ;;  %v108_v0 = vpack.c.bf16 %v101_v10, %v100_v9 }
  0x24   :  { %498 = vmatprep.subr.bf16.mxu0 %v598_v1  ;;  %521 = vmatprep.subr.bf16.mxu1 %v598_v1 }
  0x25   :  { %468 = vmatprep.mubr.bf16.mxu1 %v90_v62  ;;  %492 = vmatprep.mubr.bf16.mxu0 %v70_v42 }
  0x27   :  { %499 = vmatpush3.bf16.msra.mxu0 %v598_v1  ;;  %529 = vmatpush3.bf16.msra.mxu1 %v598_v1  ;;  %v94_v1 = vunpack.c.l.bf16 %v89_v59 }
  0x28   :  { %500 = vmatprep.subr.bf16.mxu0 %v609_v2  ;;  %522 = vmatprep.subr.bf16.mxu1 %v609_v2 }
  0x2a   :  { %469 = vmatmul.mubr.bf16.gmra.mrb[4].mxu1 %v91_v13  ;;  %493 = vmatmul.mubr.bf16.gmra.mrb[4].mxu0 %v71_v56 }
  0x2b   :  { %501 = vmatpush3.bf16.msra.mxu0 %v609_v2  ;;  %530 = vmatpush3.bf16.msra.mxu1 %v609_v2  ;;  %v95_v2 = vunpack.c.h.bf16 %v89_v59 }
  0x2c   :  { %502 = vmatprep.subr.bf16.mxu0 %v616_v3  ;;  %523 = vmatprep.subr.bf16.mxu1 %v616_v3 }
  0x2d   :  { %512 = vmatprep.mubr.bf16.mxu0 %v108_v0  ;;  %516 = vmatprep.mubr.bf16.mxu1 %v110_v14  ;;  %v103_v17 = vsub.f32 %v688_v55, %v95_v2 }
  0x2f   :  { %503 = vmatpush3.bf16.msra.mxu0 %v616_v3  ;;  %531 = vmatpush3.bf16.msra.mxu1 %v616_v3  ;;  %v102_v3 = vsub.f32 %v686_v54, %v94_v1 }
  0x30   :  { %504 = vmatprep.subr.bf16.mxu0 %v657_v20  ;;  %524 = vmatprep.subr.bf16.mxu1 %v657_v20 }
  0x33   :  { %505 = vmatpush3.bf16.msra.mxu0 %v657_v20  ;;  %532 = vmatpush3.bf16.msra.mxu1 %v657_v20  ;;  %v109_v20 = vpack.c.bf16 %v103_v17, %v102_v3 }
  0x34   :  { %506 = vmatprep.subr.bf16.mxu0 %v666_v35  ;;  %525 = vmatprep.subr.bf16.mxu1 %v666_v35 }
  0x37   :  { %507 = vmatpush3.bf16.msra.mxu0 %v666_v35  ;;  %533 = vmatpush3.bf16.msra.mxu1 %v666_v35 }
  0x38   :  { %508 = vmatprep.subr.bf16.mxu0 %v675_v43  ;;  %526 = vmatprep.subr.bf16.mxu1 %v675_v43 }
  0x3b   :  { %509 = vmatpush3.bf16.msra.mxu0 %v675_v43  ;;  %534 = vmatpush3.bf16.msra.mxu1 %v675_v43 }
  0x3c   :  { %510 = vmatprep.subr.bf16.mxu0 %v684_v53  ;;  %527 = vmatprep.subr.bf16.mxu1 %v684_v53 }
  0x3f   :  { %511 = vmatpush3.bf16.msra.mxu0 %v684_v53  ;;  %535 = vmatpush3.bf16.msra.mxu1 %v684_v53 }
  0x42   :  { %513 = vmatmul.mubr.bf16.vlgmr.msra.gmra.mrb[0].mxu0 %v109_v20  ;;  %517 = vmatmul.mubr.bf16.vlgmr.msra.gmra.mrb[8].mxu1 %v111_v21 }
  0xf5   :  { %v466_v22 = vpop.f32.mrb[0].mxu1 }
  0xf6   :  { %v210_v23 = vpop.f32.mrb[1].mxu1 }
  0xf7   :  { %v467_v24 = vpop.f32.mrb[2].mxu1 }
  0xf8   :  { %v213_v25 = vpop.f32.mrb[3].mxu1 }
  0xfd   :  { %v470_v26 = vpop.f32.mrb[4].mxu1  ;;  %v494_v27 = vpop.f32.mrb[4].mxu0 }
  0xfe   :  { %v300_v28 = vadd.f32 %v494_v27, %v470_v26  ;;  %v226_v29 = vpop.f32.mrb[5].mxu1  ;;  %v291_v30 = vpop.f32.mrb[5].mxu0 }
  0xff   :  { %v292_v31 = vadd.f32 %v291_v30, %v226_v29  ;;  %v471_v32 = vpop.f32.mrb[6].mxu1  ;;  %v495_v33 = vpop.f32.mrb[6].mxu0 }
 0x100   :  { %v303_v34 = vadd.f32 %v495_v33, %v471_v32  ;;  %v229_v35 = vpop.f32.mrb[7].mxu1  ;;  %v294_v36 = vpop.f32.mrb[7].mxu0 }
 0x101   :  { %v295_v37 = vadd.f32 %v294_v36, %v229_v35 }
 0x115   :  { %v514_v38 = vpop.f32.mrb[0].mxu0  ;;  %v518_v40 = vpop.f32.mrb[8].mxu1 }
 0x116   :  { %v536_v41 = vadd.f32 %v514_v38, %v466_v22  ;;  %v377_v42 = vadd.f32 %v518_v40, %v300_v28  ;;  %v340_v43 = vpop.f32.mrb[1].mxu0  ;;  %v356_v44 = vpop.f32.mrb[9].mxu1 }
 0x117   :  { %v537_v45 = vadd.f32 %v340_v43, %v210_v23  ;;  %v375_v46 = vadd.f32 %v356_v44, %v292_v31  ;;  %v515_v47 = vpop.f32.mrb[2].mxu0  ;;  %v519_v48 = vpop.f32.mrb[10].mxu1 }
 0x118   :  { %v383_v49 = vadd.f32 %v536_v41, %v380_v39  ;;  %v387_v50 = vadd.f32 %v380_v39, %v377_v42  ;;  %v538_v51 = vadd.f32 %v515_v47, %v467_v24  ;;  %v378_v52 = vadd.f32 %v519_v48, %v303_v34  ;;  %v343_v53 = vpop.f32.mrb[3].mxu0  ;;  %v359_v54 = vpop.f32.mrb[11].mxu1 }
 0x119   :  { %v381_v55 = vadd.f32 %v537_v45, %v380_v39  ;;  %v385_v56 = vadd.f32 %v380_v39, %v375_v46  ;;  %v539_v57 = vadd.f32 %v343_v53, %v213_v25  ;;  %v376_v58 = vadd.f32 %v359_v54, %v295_v37 }
 0x11a   :  { %392 = vst.msk [vmem:[%s772_s5 + $0x10] sm:$0xff] %vm389_vm0, %v383_v49  ;;  %396 = vst.msk [vmem:[%s772_s5 + $0x30] sm:$0xff] %vm389_vm0, %v387_v50  ;;  %v384_v59 = vadd.f32 %v538_v51, %v380_v39  ;;  %v388_v60 = vadd.f32 %v380_v39, %v378_v52 }
 0x11b   :  { %390 = vst.msk [vmem:[%s772_s5] sm:$0xff] %vm389_vm0, %v381_v55  ;;  %394 = vst.msk [vmem:[%s772_s5 + $0x20] sm:$0xff] %vm389_vm0, %v385_v56  ;;  %v382_v61 = vadd.f32 %v539_v57, %v380_v39  ;;  %v386_v62 = vadd.f32 %v380_v39, %v376_v58 }
 0x11c   :  { %393 = vst.msk [vmem:[%s772_s5 + $0x18] sm:$0xff] %vm389_vm0, %v384_v59  ;;  %397 = vst.msk [vmem:[%s772_s5 + $0x38] sm:$0xff] %vm389_vm0, %v388_v60 }
 0x11d   :  { %391 = vst.msk [vmem:[%s772_s5 + $0x8] sm:$0xff] %vm389_vm0, %v382_v61  ;;  %395 = vst.msk [vmem:[%s772_s5 + $0x28] sm:$0xff] %vm389_vm0, %v386_v62 }

</bundles_post_ra>
